<compile_context>
chip_gen: v6e
topology: v6e:2x2x1
jax: 0.10.0
libtpu: 0.0.40
codegen_flags: <defaults>
</compile_context>

<pallas_src>
import jax
import jax.numpy as jnp
from jax.experimental import pallas as pl
from jax.experimental.pallas import tpu as pltpu


def _make_ce_kernel(N, TN, C, ignore_index, has_weight, per_sample):
    """Build the per-tile cross-entropy kernel body (constants baked in)."""

    def kernel(*refs):
        if has_weight:
            logits_ref, label_ref, w_ref, out_ref = refs
        else:
            logits_ref, label_ref, out_ref = refs
            w_ref = None

        i = pl.program_id(0)

        # (TN, C) logits in the original dtype; widen to f32 on the VPU.
        x = logits_ref[...].astype(jnp.float32)
        lbl = label_ref[...]                                    # (TN, 1) int32

        # Row validity: ragged last tile (row >= N) and ignored labels.
        row = i * TN + jax.lax.broadcasted_iota(jnp.int32, (TN, 1), 0)
        valid = row < N
        if ignore_index is not None:
            valid = jnp.logical_and(valid, lbl != jnp.int32(ignore_index))

        # Clamp garbage / ignored rows so exp/log stay finite
        # (0 * inf would otherwise poison the tile sum with NaN).
        x = jnp.where(valid, x, 0.0)

        # Numerically stable logsumexp over the class (lane) axis.
        m = jnp.max(x, axis=-1, keepdims=True)
        lse = m + jnp.log(jnp.sum(jnp.exp(x - m), axis=-1, keepdims=True))

        # Gather the label logit via one-hot compare (no lane gather on TPU).
        col = jax.lax.broadcasted_iota(jnp.int32, (TN, C), 1)
        picked = jnp.sum(jnp.where(col == lbl, x, 0.0), axis=-1, keepdims=True)

        ce = lse - picked                                       # (TN, 1)
        if has_weight:
            ce = ce * w_ref[...]          # apply weight BEFORE the mask so
        loss = jnp.where(valid, ce, 0.0)  # garbage rows can't inject NaN.

        if per_sample:
            out_ref[...] = loss                                   # (TN, 1)
        else:
            # One scalar partial sum per tile, splatted into a lane-dense
            # (1, 8, 128) block (tiny writeback, unmasked stores).
            out_ref[...] = jnp.broadcast_to(jnp.sum(loss), (1, 8, 128))

    return kernel


def _pick_row_tile(N, C, itemsize):
    """Largest row tile whose double-buffered logits fit a v7x-safe budget."""
    budget = 24 * 1024 * 1024                     # 2 x (TN, C) logits buffers
    tn = max(1, budget // (2 * C * itemsize))
    tn = min(tn, 1024)
    if tn >= N:
        if N > 8:
            # Whole problem fits one tile: split in two so a 2-TC chip (v7x)
            # still gets >= 2 parallel grid steps.
            tn = -(-N // 2)
            tn = -(-tn // 8) * 8                  # round up to a multiple of 8
        else:
            tn = N                                # tiny: block == full dim
    else:
        tn = max(8, (tn // 8) * 8)                # round down to multiple of 8
    return int(tn)


def cross_entropy_with_ignore(cls_score, label, weight=None, reduction="mean",
                              avg_factor=None, ignore_index=None,
                              class_weight=None, loss_weight=1.0):
    """Forward of CrossEntropyLossWithIgnore (reduction in {'none','mean','sum'})."""
    assert reduction in ("none", "mean", "sum")
    if class_weight is not None:
        # TODO(synk): per-class weighting not implemented.
        raise NotImplementedError("class_weight is not supported")

    N, C = cls_score.shape
    itemsize = jnp.dtype(cls_score.dtype).itemsize
    TN = _pick_row_tile(N, C, itemsize)
    num_tiles = int(pl.cdiv(N, TN))

    has_weight = weight is not None
    per_sample = reduction == "none"

    inputs = [cls_score, label.astype(jnp.int32).reshape(N, 1)]
    in_specs = [
        pl.BlockSpec((TN, C), lambda i: (i, 0)),      # logits (original dtype)
        pl.BlockSpec((TN, 1), lambda i: (i, 0)),      # labels
    ]
    if has_weight:
        inputs.append(weight.astype(jnp.float32).reshape(N, 1))
        in_specs.append(pl.BlockSpec((TN, 1), lambda i: (i, 0)))

    if per_sample:
        out_shape = jax.ShapeDtypeStruct((N, 1), jnp.float32)
        out_spec = pl.BlockSpec((TN, 1), lambda i: (i, 0))
    else:
        out_shape = jax.ShapeDtypeStruct((num_tiles, 8, 128), jnp.float32)
        out_spec = pl.BlockSpec((1, 8, 128), lambda i: (i, 0, 0))

    kernel = _make_ce_kernel(N, TN, C, ignore_index, has_weight, per_sample)

    out = pl.pallas_call(
        kernel,
        out_shape=out_shape,
        grid=(num_tiles,),
        in_specs=in_specs,
        out_specs=out_spec,
        compiler_params=pltpu.CompilerParams(
            dimension_semantics=("parallel",),
            vmem_limit_bytes=48 * 1024 * 1024,
        ),
    )(*inputs)

    if per_sample:
        return loss_weight * out[:, 0]

    total = out[:, 0, 0].sum()
    # mmcv.weight_reduce_loss semantics (weight/ignore already applied in-kernel)
    if avg_factor is None:
        loss = total / N if reduction == "mean" else total
    else:
        if reduction == "mean":
            loss = total / avg_factor
        else:
            raise ValueError('avg_factor can not be used with reduction="sum"')
    return loss_weight * loss


def _ref_per_sample(cls_score, label, ignore_index, weight=None):
    """Pure-JAX reference: per-sample CE with ignore/weight masking."""
    logp = jax.nn.log_softmax(cls_score.astype(jnp.float32), axis=-1)
    if ignore_index is None:
        valid = jnp.ones(label.shape, bool)
    else:
        valid = label != ignore_index
    safe = jnp.where(valid, label, 0).astype(jnp.int32)
    per = -jnp.take_along_axis(logp, safe[:, None], axis=-1)[:, 0]
    per = jnp.where(valid, per, 0.0)
    if weight is not None:
        per = per * weight.astype(jnp.float32)
    return per


if __name__ == "__main__":
    key = jax.random.PRNGKey(0)
    k1, k2, k3 = jax.random.split(key, 3)

    ignore_index = 255

    # --- test 1: f32 logits, reduction='mean' (default module path) ---------
    N, C = 16, 10
    cls_score = jax.random.normal(k1, (N, C), dtype=jnp.float32)
    label = jax.random.randint(k2, (N,), 0, C).astype(jnp.int32)
    label = label.at[3].set(ignore_index).at[7].set(ignore_index)

    loss = cross_entropy_with_ignore(cls_score, label, reduction="mean",
                                     ignore_index=ignore_index, loss_weight=1.0)
    loss = jax.block_until_ready(loss)
    ref = _ref_per_sample(cls_score, label, ignore_index).mean()
    assert jnp.allclose(loss, ref, atol=1e-5, rtol=1e-5), (loss, ref)

    # --- test 2: ragged row count, per-sample weight, reduction='none' ------
    N2 = 13
    cls2 = jax.random.normal(k3, (N2, C), dtype=jnp.float32)
    lbl2 = jax.random.randint(k1, (N2,), 0, C).astype(jnp.int32)
    lbl2 = lbl2.at[5].set(ignore_index)
    w2 = jnp.linspace(0.5, 1.5, N2, dtype=jnp.float32)

    per = cross_entropy_with_ignore(cls2, lbl2, weight=w2, reduction="none",
                                    ignore_index=ignore_index, loss_weight=2.0)
    per = jax.block_until_ready(per)
    per_ref = 2.0 * _ref_per_sample(cls2, lbl2, ignore_index, w2)
    assert jnp.allclose(per, per_ref, atol=1e-5, rtol=1e-5), (per, per_ref)

    # --- test 3: bf16 logits fed straight through, mean with avg_factor -----
    cls_bf16 = cls_score.astype(jnp.bfloat16)
    loss3 = cross_entropy_with_ignore(cls_bf16, label, reduction="mean",
                                      avg_factor=11.0, ignore_index=ignore_index)
    loss3 = jax.block_until_ready(loss3)
    ref3 = _ref_per_sample(cls_bf16.astype(jnp.float32), label,
                           ignore_index).sum() / 11.0
    assert jnp.allclose(loss3, ref3, atol=1e-4, rtol=1e-4), (loss3, ref3)

    print("KERNEL_OK")
</pallas_src>

<mosaic_0001>
module attributes {stable_mosaic.version = 11 : i64} {
  func.func @kernel(%arg0: i32, %arg1: memref<8x10xf32, #tpu.memory_space<vmem>>, %arg2: memref<8x1xi32, #tpu.memory_space<vmem>>, %arg3: memref<1x8x128xf32, #tpu.memory_space<vmem>>) attributes {dimension_semantics = [#tpu.dimension_semantics<parallel>], iteration_bounds = array<i64: 2>, scalar_prefetch = 0 : i64, scratch_operands = 0 : i64, tpu.core_type = #tpu.core_type<tc>, window_params = [{transform_indices = @transform_0, window_bounds = array<i64: 8, 10>}, {transform_indices = @transform_1, window_bounds = array<i64: 8, 1>}, {transform_indices = @transform_2, window_bounds = array<i64: 1, 8, 128>}]} {
    %c0 = arith.constant 0 : index
    %c0_0 = arith.constant 0 : index
    %0 = vector.load %arg1[%c0, %c0_0] : memref<8x10xf32, #tpu.memory_space<vmem>>, vector<8x10xf32>
    %c0_1 = arith.constant 0 : index
    %c0_2 = arith.constant 0 : index
    %1 = vector.load %arg2[%c0_1, %c0_2] : memref<8x1xi32, #tpu.memory_space<vmem>>, vector<8x1xi32>
    %c8_i32 = arith.constant 8 : i32
    %2 = arith.muli %arg0, %c8_i32 : i32
    %3 = tpu.iota {dimensions = array<i32: 0>} : vector<8x1xi32>
    %4 = vector.broadcast %2 : i32 to vector<8x1xi32>
    %5 = arith.addi %4, %3 : vector<8x1xi32>
    %c16_i32 = arith.constant 16 : i32
    %6 = vector.broadcast %c16_i32 : i32 to vector<8x1xi32>
    %7 = arith.cmpi slt, %5, %6 : vector<8x1xi32>
    %c255_i32 = arith.constant 255 : i32
    %8 = vector.broadcast %c255_i32 : i32 to vector<8x1xi32>
    %9 = arith.cmpi ne, %1, %8 : vector<8x1xi32>
    %10 = arith.andi %7, %9 : vector<8x1xi1>
    %cst = arith.constant 0.000000e+00 : f32
    %11 = vector.shape_cast %10 : vector<8x1xi1> to vector<8x1xi1>
    %12 = vector.broadcast %11 : vector<8x1xi1> to vector<8x10xi1>
    %13 = vector.broadcast %cst : f32 to vector<8x10xf32>
    %14 = arith.select %12, %0, %13 : vector<8x10xi1>, vector<8x10xf32>
    %cst_3 = arith.constant dense<0xFF800000> : vector<8xf32>
    %15 = vector.multi_reduction <maximumf>, %14, %cst_3 [1] : vector<8x10xf32> to vector<8xf32>
    %16 = vector.shape_cast %15 : vector<8xf32> to vector<8x1xf32>
    %17 = vector.broadcast %16 : vector<8x1xf32> to vector<8x10xf32>
    %18 = arith.subf %14, %17 : vector<8x10xf32>
    %19 = math.exp %18 : vector<8x10xf32>
    %cst_4 = arith.constant dense<0.000000e+00> : vector<8xf32>
    %20 = vector.multi_reduction <add>, %19, %cst_4 [1] : vector<8x10xf32> to vector<8xf32>
    %21 = vector.shape_cast %20 : vector<8xf32> to vector<8x1xf32>
    %22 = math.log %21 : vector<8x1xf32>
    %23 = arith.addf %16, %22 : vector<8x1xf32>
    %24 = tpu.iota {dimensions = array<i32: 1>} : vector<8x10xi32>
    %25 = vector.broadcast %1 : vector<8x1xi32> to vector<8x10xi32>
    %26 = arith.cmpi eq, %24, %25 : vector<8x10xi32>
    %cst_5 = arith.constant 0.000000e+00 : f32
    %27 = vector.broadcast %cst_5 : f32 to vector<8x10xf32>
    %28 = arith.select %26, %14, %27 : vector<8x10xi1>, vector<8x10xf32>
    %cst_6 = arith.constant dense<0.000000e+00> : vector<8xf32>
    %29 = vector.multi_reduction <add>, %28, %cst_6 [1] : vector<8x10xf32> to vector<8xf32>
    %30 = vector.shape_cast %29 : vector<8xf32> to vector<8x1xf32>
    %31 = arith.subf %23, %30 : vector<8x1xf32>
    %cst_7 = arith.constant 0.000000e+00 : f32
    %32 = vector.broadcast %cst_7 : f32 to vector<8x1xf32>
    %33 = arith.select %10, %31, %32 : vector<8x1xi1>, vector<8x1xf32>
    %34 = vector.shape_cast %33 : vector<8x1xf32> to vector<1x8x1xf32>
    %cst_8 = arith.constant dense<0.000000e+00> : vector<1xf32>
    %35 = vector.multi_reduction <add>, %34, %cst_8 [1, 2] : vector<1x8x1xf32> to vector<1xf32>
    %36 = vector.shape_cast %35 : vector<1xf32> to vector<1x1x1xf32>
    %37 = vector.extract %36[0, 0, 0] : f32 from vector<1x1x1xf32>
    %38 = vector.broadcast %37 : f32 to vector<1x8x128xf32>
    %c0_9 = arith.constant 0 : index
    %c0_10 = arith.constant 0 : index
    %c0_11 = arith.constant 0 : index
    %39 = vector.load %arg3[%c0_9, %c0_10, %c0_11] : memref<1x8x128xf32, #tpu.memory_space<vmem>>, vector<1x8x128xf32>
    tpu.vector_store %arg3[%c0_9, %c0_10, %c0_11], %38 {strides = array<i32>} : memref<1x8x128xf32, #tpu.memory_space<vmem>>, vector<1x8x128xf32>,
    return
  }
  func.func @transform_0(%arg0: i32) -> (i32, i32) {
    %c0_i32 = arith.constant 0 : i32
    %c0_i32_0 = arith.constant 0 : i32
    return %arg0, %c0_i32 : i32, i32
  }
  func.func @transform_1(%arg0: i32) -> (i32, i32) {
    %c0_i32 = arith.constant 0 : i32
    %c0_i32_0 = arith.constant 0 : i32
    return %arg0, %c0_i32 : i32, i32
  }
  func.func @transform_2(%arg0: i32) -> (i32, i32, i32) {
    %c0_i32 = arith.constant 0 : i32
    %c0_i32_0 = arith.constant 0 : i32
    %c0_i32_1 = arith.constant 0 : i32
    return %arg0, %c0_i32, %c0_i32_0 : i32, i32, i32
  }
}

</mosaic_0001>

<bundles_post_ra>
// kernel: tpu_custom_call.1
= control target key start
LH: loop header
LB: loop body
LE: loop exit
PB: predicated region body
PF: predicated region fallthrough
CT: control target
= control target key end

     0   :  { %7 = vsyncpa [#allocation3], 0  ;;  %s539_s0 = inlined_call_operand.vmem [shape: f32[16,10], index: 0, kind: input, shape index: {}]   ;;  %s540_s1 = inlined_call_operand.vmem [shape: s32[16,1], index: 1, kind: input, shape index: {}]   ;;  %s541_s2 = inlined_call_operand.hbm [shape: f32[2,8,128], index: 2, kind: output, shape index: {}]  }
   0x1   :  { %9 = vsyncpa [#allocation3 + $0x1], 0  ;;  %s434_s9 = smov 0   ;;  %s436_s10 = smov 0  }
   0x2   :  { %s438_s11 = smov 0   ;;  %s440_s12 = smov 0  }
   0x3 LB: > { %s455_s13 = sadd.s32 4294967295, %s415_s12   ;;  %s295_s14 = sadd.s32 4294967294, %s415_s12   ;;  %s415_s12 = sphi %s440_s12, %s549_s12   ;;  %s411_s11 = sphi %s438_s11, %s548_s11   ;;  %s407_s10 = sphi %s436_s10, %s547_s10   ;;  %s403_s9 = sphi %s434_s9, %s546_s9  }
   0x4   : > { %s459_s15 = sadd.s32 1, %s415_s12   ;;  %s74_s16 = sadd.s32 1, %s411_s11 }
   0x5   : > { %s71_s17 = ssub.s32 %s415_s12, %s459_s15  ;;  %p84_p0 = scmp.ne.s32.totalorder %s411_s11, %s407_s10 }
   0x6   : > { %p72_p1 = scmp.eq.s32.totalorder %s71_s17, 0  ;;  %p85_p2 = scmp.eq.s32.totalorder %s455_s13, 1 }
   0x7   : > { %p90_p3 = scmp.ne.s32.totalorder %s407_s10, %s403_s9  ;;  %p91_p4 = scmp.eq.s32.totalorder %s295_s14, 1 }
   0x8   : > { %s470_s18 = scalar_select %p72_p1, %s411_s11, %s74_s16  }
   0x9   : > { %p472_p5 = por %p85_p2, %p84_p0  ;;  %p476_p6 = por %p91_p4, %p90_p3 }
   0xa   : > { %p298_p7 = scmp.ge.s32.totalorder %s415_s12, 1  ;;  %p123_p8 = scmp.lt.s32.totalorder %s415_s12, 3 }
   0xc   : > { %p124_p9 = pnand %p298_p7, %p123_p8 }
   0xd   : > { %p148_p10 = scmp.lt.s32.totalorder (!%p124_p9), %s455_s13, 1  ;;  %s302_s21 = sshll.u32 (!%p124_p9), %s455_s13, 3 }
   0xe   : > { %127 = sbr.rel (%p124_p9) target bundleno = 686 (0x2ae), region = 28  ;;  %s145_s30 = sand.u32 (!%p124_p9), 1, %s407_s10  }
   0xf   : > { %s299_s3 = sshll.u32 (!%p124_p9), %s145_s30, 3  ;;  %s304_s6 = sshll.u32 (!%p124_p9), %s455_s13, 7 }
  0x10   : > { %s147_s4 = scalar_lea.vmem (!%p124_p9), [#allocation2], %s299_s3  ;;  %s222_s16 = scalar_lea.hbm (!%p124_p9), %s541_s2, %s304_s6 }
  0x11   : > { %s224_s5 = sshll.u32 (!%p124_p9), %s147_s4, 4  ;;  %s211_s17 = scalar_lea.sflag (!%p124_p9), [#allocation3], %s145_s30  ;;  %s501_s5 = int_to_ptr.vmem [resolvable:$true] %s224_s5 }
  0x13   : > { %v159_v0 = vlaneseq  ;;  %v417_v1 = vmov 0   ;;  %v161_v2 = vstv %s302_s21  ;;  %s149_s22 = scalar_select %p148_p10, %s455_s13, 1  ;;  %vm172_vm3 = vcmask 80896  }
  0x14   : > { %349 = vset.pattern.permute.xlu0 %v417_v1  ;;  %350 = vset.pattern.permute.xlu1 %v417_v1  ;;  %vm197_vm6 = vcmask 7168   ;;  %s355_s21 = scalar_lea.vmem %s501_s5, 128 }
  0x15   : > { %v160_v3 = vshrl.u32 %v159_v0, 7  ;;  %s300_s23 = sshll.u32 %s149_s22, 3  ;;  %v186_v8 = vand.u32 127, %v159_v0  ;;  %p356_p11 = scmp.ne.s32.totalorder %s501_s5, %s355_s21 }
  0x16   : > { %s155_s26 = scalar_lea.vmem %s540_s1, %s300_s23  ;;  %s151_s29 = scalar_lea.vmem %s539_s0, %s300_s23 }
  0x17   : > { %v162_v4 = vadd.s32 %v161_v2, %v160_v3  ;;  %v157_v5 = vld [vmem:[%s155_s26] sm:$0xff]  ;;  %p357_p12 = pnand %p356_p11, %p472_p5  ;;  %s418_s22 = smov [#allocation2]  }
  0x18   : > { %vm164_vm1 = vcmp.ne.s32.totalorder %v157_v5, 255  ;;  %188 = vperm.xlu1 %350, %v157_v5   ;;  %v156_v10 = vld [vmem:[%s151_s29] sm:$0xff]  ;;  %s359_s13 = sshll.u32 %s418_s22, 4  ;;  %s360_s13 = int_to_ptr.vmem [resolvable:$false] %s359_s13 }
  0x19   : > { %vm163_vm0 = vcmp.lt.s32.totalorder %v162_v4, 16  ;;  %p358_p13 = pneg %p357_p12  ;;  %s361_s23 = scalar_lea.vmem %s360_s13, 256 }
  0x1a   : > { %vm488_vm2 = vmand %vm163_vm0, %vm164_vm1  ;;  %p362_p0 = scmp.lt.s32.totalorder %s501_s5, %s360_s13  ;;  %p363_p1 = scmp.lt.s32.totalorder %s361_s23, %s355_s21 }
  0x1b   : > { %v166_v7 = vsel %vm488_vm2, 1, %v417_v1 }
  0x1c   : > { %168 = vperm.xlu0 %349, %v166_v7   ;;  %p364_p2 = por %p363_p1, %p362_p0 }
  0x1e   : > { %p365_p3 = pnand %p364_p2, %p358_p13 }
  0x93   : > { %v189_v9 = vpop.permute.xlu1 %188 }
  0x94   : > { %vm190_vm5 = vcmp.eq.s32.totalorder %v186_v8, %v189_v9 }
  0x97   : > { %v169_v11 = vpop.permute.xlu0 %168 }
  0x98   : > { %vm170_vm4 = vcmp.eq.s32.totalorder %v169_v11, 1 }
  0x99   : > { %v171_v12 = vsel %vm170_vm4, %v156_v10, 0.0 }
  0x9a   : > { %v173_v13 = vsel %vm172_vm3, %v171_v12, -inf  ;;  %v191_v14 = vsel %vm190_vm5, %v171_v12, 0.0 }
  0x9b   : > { %174 = vmax.xlane.f32.xlu0 %v173_v13  ;;  %v192_v15 = vsel %vm172_vm3, %v191_v14, 0.0 }
  0x9f   : > { %193 = vadd.xlane.f32.xlu0 %v192_v15 }
 0x124   : > { %v175_v16 = vpop.xlane.xlu0 %174 }
 0x125   : > { %v176_v17 = vsub.f32 %v171_v12, %v175_v16 }
 0x127   : > { %v177_v18 = vmul.f32 1.442695, %v176_v17 }
 0x128   : > { %v194_v25 = vpop.xlane.xlu0 %193 }
 0x129   : > { %351 = vpow2.f32 %v177_v18 }
 0x136   : > { %v352_v19 = vpop.eup %351 }
 0x137   : > { %v179_v20 = vsel %vm172_vm3, %v352_v19, 0.0 }
 0x138   : > { %180 = vadd.xlane.f32.xlu1 %v179_v20 }
 0x1c1   : > { %v181_v21 = vpop.xlane.xlu1 %180 }
 0x1c2   : > { %353 = vlog2.f32 %v181_v21 }
 0x1cf   : > { %v354_v22 = vpop.eup %353 }
 0x1d0   : > { %v183_v23 = vmul.f32 0.6931472, %v354_v22 }
 0x1d2   : > { %v184_v24 = vadd.f32 %v183_v23, %v175_v16 }
 0x1d4   : > { %v195_v26 = vsub.f32 %v184_v24, %v194_v25 }
 0x1d6   : > { %v196_v27 = vsel %vm488_vm2, %v195_v26, 0.0 }
 0x1d7   : > { %v198_v28 = vsel %vm197_vm6, %v196_v27, 0.0 }
 0x1d8   : > { %199 = vadd.xlane.f32.xlu0 %v198_v28 }
 0x261   : > { %v200_v29 = vpop.xlane.xlu0 %199 }
 0x262   : > { %v201_v30 = vrot.slane %v200_v29, 4 }
 0x264   : > { %v202_v31 = vadd.f32 %v201_v30, %v200_v29 }
 0x266   : > { %v203_v32 = vrot.slane %v202_v31, 2 }
 0x268   : > { %v204_v33 = vadd.f32 %v203_v32, %v202_v31 }
 0x26a   : > { %v205_v34 = vrot.slane %v204_v33, 1 }
 0x26c   : > { %v206_v35 = vadd.f32 %v205_v34, %v204_v33 }
 0x26e   : > { %307 = vpush %v206_v35 }
 0x29f   : > { %s308_s7 = spop %307 }
 0x2a0   : > { %v208_v36 = vstv %s308_s7 }
 0x2a1   : > { %209 = vst [vmem:[%s147_s4] sm:$0xff] %v208_v36 }
 0x2a2   : > { %368 = shalt.err (!%p365_p3)
}
 0x2a3   : > { %s369_s24 = scalar_lea.hbm %s222_s16, 128  ;;  %s373_s27 = scalar_lea.hbm %s541_s2, 256 }
 0x2a4   : > { %p370_p4 = scmp.ne.s32.totalorder %s222_s16, %s369_s24  ;;  %p374_p9 = scmp.lt.s32.totalorder %s222_s16, %s541_s2 }
 0x2a5   : > { %p375_p10 = scmp.lt.s32.totalorder %s373_s27, %s369_s24 }
 0x2a6   : > { %p371_p7 = pnand %p370_p4, %p472_p5 }
 0x2a7   : > { %p376_p11 = por %p375_p10, %p374_p9 }
 0x2a8   : > { %p372_p8 = pneg %p371_p7 }
 0x2aa   : > { %p377_p12 = pnand %p376_p11, %p372_p8 }
 0x2ac   : > { %380 = shalt.err (!%p377_p12)
}
 0x2ad   : > { %309 = dma.vmem_to_hbm [thread:$0]  (%p472_p5), %s501_s5, 128, %s222_s16, %s211_s17  }
 0x2ae PF: > { %p315_p13 = scmp.ge.s32.totalorder %s415_s12, 2  ;;  %s236_s30 = sand.u32 1, %s403_s9  }
 0x2af   : > { %s237_s3 = scalar_lea.sflag [#allocation3], %s236_s30 }
 0x2b0   : > { %p312_p0 = pnand %p315_p13, %p476_p6 }
 0x2b2   : > { %p313_p1 = pneg %p312_p0 }
 0x2b4   : > { %398 = dma.done.wait (%p313_p1), %s237_s3, 128  }
 0x2b5   : > { %400 = vsyncadd (%p313_p1), %s237_s3, 4294967168  ;;  %p12_p2 = scmp.ge.s32.totalorder %s459_s15, 4   ;;  %s546_s9 = smov %s407_s10 }
 0x2b6   : > { %s547_s10 = smov %s411_s11  ;;  %s548_s11 = smov %s470_s18 }
 0x2b7   : > { %s549_s12 = smov %s459_s15  ;;  %14 = sbr.rel (!%p12_p2) target bundleno = 3 (0x3), region = 66 }
 0x2bc   :  { %242 = vsyncpa [#allocation3], 1 }
 0x2bd   :  { %244 = vsyncpa [#allocation3 + $0x1], 1 }

</bundles_post_ra>
